<compile_context>
chip_gen: v5e
topology: v5e:2x2
jax: 0.10.0
libtpu: 0.0.40
codegen_flags: <defaults>
</compile_context>

<pallas_src>
import jax
import jax.numpy as jnp
from jax.experimental import pallas as pl
from jax.experimental.pallas import tpu as pltpu

_LANE = 128
_TILE_BYTES_CAP = 2 * 1024 * 1024  # per-buffer tile cap; 2x in + 2x out ~ 8 MiB live


def _copy_kernel(x_ref, o_ref):
    # Pure lane-dense 2D copy of the current tile; no in-kernel reshape/relayout.
    o_ref[...] = x_ref[...]


def _pick_slab(total, fallback_rows, fallback_cols):
    """Factor `total` into (rows, cols) with cols a large multiple of 128.

    Shape-agnostic: independent of N/C/H/W, so a tiny batch doesn't force
    narrow row tiles. Falls back to (N, C*H*W) if no such factorization exists.
    """
    for c in (8192, 4096, 2048, 1024, 512, 256, 128):
        if total % c == 0:
            return total // c, c
    return fallback_rows, fallback_cols


def _materialize_2d(x2d):
    """Materialize a copy of a 2D array with a tiled Pallas copy kernel."""
    rows, cols = x2d.shape
    itemsize = jnp.dtype(x2d.dtype).itemsize
    pack = max(1, 4 // itemsize)      # sublane packing: f32->1, bf16->2, int8->4
    base_r = 8 * pack                 # minimum unmasked sublane tile for this dtype

    # Lane tile: largest power-of-two multiple of 128 that fits; full cols if <128.
    tc = cols
    for c in (4096, 2048, 1024, 512, 256, 128):
        if cols >= c:
            tc = c
            break

    # Sublane tile: dtype-aware multiple of base_r, capped so one tile <= ~2 MiB.
    if rows < base_r:
        tr = rows                     # full dim (legal even if < 8)
    else:
        max_tr = max(base_r, _TILE_BYTES_CAP // (tc * itemsize))
        tr = min(rows, max_tr)
        tr -= tr % base_r
        tr = max(tr, base_r)

    grid = (pl.cdiv(rows, tr), pl.cdiv(cols, tc))

    # NOTE: input_output_aliases={0: 0} could elide the second HBM buffer when
    # the caller donates x, but it makes the "materialized copy" an in-place
    # identity, so it is intentionally not used here.
    return pl.pallas_call(
        _copy_kernel,
        out_shape=jax.ShapeDtypeStruct((rows, cols), x2d.dtype),
        grid_spec=pltpu.PrefetchScalarGridSpec(
            num_scalar_prefetch=0,
            grid=grid,
            in_specs=[pl.BlockSpec((tr, tc), lambda i, j: (i, j))],
            out_specs=pl.BlockSpec((tr, tc), lambda i, j: (i, j)),
        ),
        compiler_params=pltpu.CompilerParams(
            dimension_semantics=("parallel", "parallel"),
        ),
    )(x2d)


def flatten(x, maintain: int = 1, materialize: bool = False):
    """Pallas/JAX implementation of DSOM.Flatten.forward (NCHW input).

    maintain=1 -> (N, C*H*W); maintain=2 -> (N, C, H*W); anything else -> x.
    By default this is a metadata-only reshape (no kernel launch, no HBM
    traffic).  Pass materialize=True to force a fresh buffer via a tiled
    Pallas copy kernel.
    """
    if maintain not in (1, 2):
        # PyTorch module returns x unchanged for any other `maintain` value.
        return x

    N, C, H, W = x.shape
    out_shape = (N, C * H * W) if maintain == 1 else (N, C, H * W)

    if not materialize:
        # Row-major reshape of a contiguous array == torch .view: free.
        return jnp.reshape(x, out_shape)

    total = N * C * H * W
    rows, cols = _pick_slab(total, N, C * H * W)
    x2d = jnp.reshape(x, (rows, cols))        # metadata-only
    y2d = _materialize_2d(x2d)                # Pallas copy
    return jnp.reshape(y2d, out_shape)        # metadata-only


if __name__ == "__main__":
    key = jax.random.PRNGKey(0)
    N, C, H, W = 2, 4, 16, 16
    x = jax.random.normal(key, (N, C, H, W), dtype=jnp.float32)

    ref1 = jnp.reshape(x, (N, -1))
    ref2 = jnp.reshape(x, (N, C, -1))

    # Default (fast) path: metadata-only reshape, no kernel.
    y1 = jax.block_until_ready(flatten(x, maintain=1))
    assert y1.shape == (N, C * H * W) and jnp.array_equal(y1, ref1), "maintain=1 mismatch"
    y2 = jax.block_until_ready(flatten(x, maintain=2))
    assert y2.shape == (N, C, H * W) and jnp.array_equal(y2, ref2), "maintain=2 mismatch"
    y0 = jax.block_until_ready(flatten(x, maintain=0))
    assert y0.shape == x.shape and jnp.array_equal(y0, x), "maintain=0 mismatch"

    # Materialized path: exercises the Pallas copy kernel on TPU.
    m1 = jax.block_until_ready(flatten(x, maintain=1, materialize=True))
    assert m1.shape == (N, C * H * W) and jnp.array_equal(m1, ref1), "materialized maintain=1 mismatch"
    m2 = jax.block_until_ready(flatten(x, maintain=2, materialize=True))
    assert m2.shape == (N, C, H * W) and jnp.array_equal(m2, ref2), "materialized maintain=2 mismatch"

    print("KERNEL_OK")
</pallas_src>

<mosaic_0001>
module attributes {stable_mosaic.version = 11 : i64} {
  func.func @_copy_kernel(%arg0: i32, %arg1: i32, %arg2: memref<1x2048xf32, #tpu.memory_space<vmem>>, %arg3: memref<1x2048xf32, #tpu.memory_space<vmem>>) attributes {dimension_semantics = [#tpu.dimension_semantics<parallel>, #tpu.dimension_semantics<parallel>], iteration_bounds = array<i64: 1, 1>, scalar_prefetch = 0 : i64, scratch_operands = 0 : i64, tpu.core_type = #tpu.core_type<tc>, window_params = [{transform_indices = @transform_0, window_bounds = array<i64: 1, 2048>}, {transform_indices = @transform_1, window_bounds = array<i64: 1, 2048>}]} {
    %c0 = arith.constant 0 : index
    %c0_0 = arith.constant 0 : index
    %0 = vector.load %arg2[%c0, %c0_0] : memref<1x2048xf32, #tpu.memory_space<vmem>>, vector<1x2048xf32>
    %c0_1 = arith.constant 0 : index
    %c0_2 = arith.constant 0 : index
    %1 = vector.load %arg3[%c0_1, %c0_2] : memref<1x2048xf32, #tpu.memory_space<vmem>>, vector<1x2048xf32>
    tpu.vector_store %arg3[%c0_1, %c0_2], %0 {strides = array<i32>} : memref<1x2048xf32, #tpu.memory_space<vmem>>, vector<1x2048xf32>,
    return
  }
  func.func @transform_0(%arg0: i32, %arg1: i32) -> (i32, i32) {
    %c0_i32 = arith.constant 0 : i32
    return %arg0, %arg1 : i32, i32
  }
  func.func @transform_1(%arg0: i32, %arg1: i32) -> (i32, i32) {
    %c0_i32 = arith.constant 0 : i32
    return %arg0, %arg1 : i32, i32
  }
}

</mosaic_0001>

<bundles_post_ra>
// kernel: tpu_custom_call.1
= control target key start
LH: loop header
LB: loop body
LE: loop exit
PB: predicated region body
PF: predicated region fallthrough
CT: control target
= control target key end

     0   :  { %6 = vsyncpa [#allocation3], 0  ;;  %s116_s0 = inlined_call_operand.hbm [shape: f32[1,2048], index: 0, kind: input, shape index: {}]   ;;  %s117_s1 = inlined_call_operand.hbm [shape: f32[1,2048], index: 1, kind: output, shape index: {}]  }
   0x1   :  { %7 = vsyncpa [#allocation4], 0  ;;  %s13_s8 = sshll.u32 %s116_s0, 4  ;;  %s98_s9 = smov [#allocation2]   ;;  %s14_s8 = int_to_ptr.hbm [resolvable:$true] %s13_s8 }
   0x2   :  { %s15_s10 = sshll.u32 %s98_s9, 4  ;;  %s16_s10 = int_to_ptr.vmem [resolvable:$true] %s15_s10 }
   0x3   :  { %18 = dma.hbm_to_vmem [thread:$0]  %s14_s8, 256, %s16_s10, [#allocation3]  }
   0x4   :  { %94 = dma.done.wait [#allocation3], 256  }
   0x5   :  { %95 = vsyncadd [#allocation3], 4294967040  ;;  %s99_s11 = smov [#allocation5]   ;;  %s34_s15 = sshll.u32 %s117_s1, 4  ;;  %v23_v0 = vld [vmem:[#allocation2] sm:$0xff]  ;;  %v24_v1 = vld [vmem:[#allocation2 + $0x8] sm:$0xff]  ;;  %s35_s15 = int_to_ptr.hbm [resolvable:$true] %s34_s15 }
   0x6   :  { %s32_s12 = sshll.u32 %s99_s11, 4  ;;  %25 = vst [vmem:[#allocation5] sm:$0xff] %v23_v0  ;;  %s33_s12 = int_to_ptr.vmem [resolvable:$true] %s32_s12 }
   0x7   :  { %26 = vst [vmem:[#allocation5 + $0x8] sm:$0xff] %v24_v1 }
   0x8   :  { %37 = dma.vmem_to_hbm [thread:$0]  %s33_s12, 256, %s35_s15, [#allocation4]  }
   0x9   :  { %96 = dma.done.wait [#allocation4], 256  }
   0xa   :  { %97 = vsyncadd [#allocation4], 4294967040 }
   0xb   :  { %42 = vsyncpa [#allocation3], 1 }
   0xc   :  { %43 = vsyncpa [#allocation4], 1 }

</bundles_post_ra>
